<compile_context>
chip_gen: v7x
topology: tpu7x:2x2x1
jax: 0.10.0
libtpu: 0.0.40
codegen_flags: <defaults>
</compile_context>

<pallas_src>
import jax
import jax.numpy as jnp
from jax.experimental import pallas as pl
from jax.experimental.pallas import tpu as pltpu


def linreg_kernel(x_ref, w_ref, b_ref, o_ref):
    # x_ref: (TM, pack*D) VMEM tile, w_ref: (pack*D, pack) VMEM (resident),
    # b_ref: (1, 1) SMEM scalar, o_ref: (TM, pack) VMEM tile.
    # MXU matmul with f32 accumulation + scalar bias add on the VPU.
    o_ref[...] = (
        jnp.dot(x_ref[...], w_ref[...], preferred_element_type=jnp.float32)
        + b_ref[0, 0]
    ).astype(o_ref.dtype)


def linear_regression_forward(x, w, b, *, block_rows=4096, compute_dtype=None):
    """forward(X) = X @ W + b.   x: (N, D), w: (D, 1), b: (1,) -> (N, 1) f32.

    block_rows:    max packed-row tile size along N (auto-shrunk for small N).
    compute_dtype: optional streaming dtype for X/W (e.g. jnp.bfloat16);
                   accumulation stays in f32 on the MXU.
    """
    n, d = x.shape
    assert w.shape == (d, 1) and b.shape == (1,)

    stream_dtype = (jnp.dtype(compute_dtype) if compute_dtype is not None
                    else jnp.dtype(x.dtype))

    # --- lane-dense packing factor (D=32 -> pack=4 -> 128-lane X rows) ------
    pack = (128 // d) if (d <= 128 and 128 % d == 0) else 1

    # Packed-row count, tile size (multiple of 8 sublanes), padded extents.
    r = pl.cdiv(n, pack)                                 # packed rows
    tm = min(int(block_rows), max(8, pl.cdiv(r, 8) * 8))  # >=8, multiple of 8
    r_pad = pl.cdiv(r, tm) * tm                          # multiple of tm
    n_pad = r_pad * pack

    x_p = x.astype(stream_dtype)
    if n_pad != n:
        x_p = jnp.pad(x_p, ((0, n_pad - n), (0, 0)))     # zero rows -> sliced off
    x_packed = x_p.reshape(r_pad, pack * d)              # free row-major view

    # Host-built block-diagonal weight: pack copies of w on the diagonal, so
    # (x_packed @ w_big)[r, j] == X[r*pack + j, :] @ W.
    w_col = w.reshape(d).astype(stream_dtype)
    if pack > 1:
        eye = jnp.eye(pack, dtype=stream_dtype)
        w_big = (eye[:, None, :] * w_col[None, :, None]).reshape(pack * d, pack)
    else:
        w_big = w_col.reshape(d, 1)

    b2d = b.reshape(1, 1).astype(jnp.float32)

    grid = (r_pad // tm,)
    itemsize = jnp.dtype(stream_dtype).itemsize
    cost = pl.CostEstimate(
        flops=2 * r_pad * (pack * d) * pack,
        transcendentals=0,
        bytes_accessed=(r_pad * pack * d * itemsize            # X stream
                        + pack * d * pack * itemsize           # W (resident)
                        + r_pad * pack * 4 + 4),               # out + bias
    )

    out = pl.pallas_call(
        linreg_kernel,
        out_shape=jax.ShapeDtypeStruct((r_pad, pack), jnp.float32),
        grid=grid,
        in_specs=[
            pl.BlockSpec((tm, pack * d), lambda i: (i, 0)),        # X tiles
            pl.BlockSpec((pack * d, pack), lambda i: (0, 0)),      # W, resident
            pl.BlockSpec((1, 1), lambda i: (0, 0),
                         memory_space=pltpu.MemorySpace.SMEM),     # bias scalar
        ],
        out_specs=pl.BlockSpec((tm, pack), lambda i: (i, 0)),
        compiler_params=pltpu.CompilerParams(
            dimension_semantics=("parallel",)),                    # 2 TCs on v7x
        cost_estimate=cost,
    )(x_packed, w_big, b2d)

    # (r_pad, pack) -> (n_pad, 1) row-major, drop padding.
    return out.reshape(n_pad, 1)[:n]


if __name__ == "__main__":
    # Small shapes consistent with the module: batch N=8, d_input=32.
    N, D_INPUT = 8, 32

    key = jax.random.PRNGKey(0)
    kx, kw, kx2 = jax.random.split(key, 3)

    # Deterministic parameter init mirroring torch: W ~ N(0, 0.01), b = 0.
    W = 0.01 * jax.random.normal(kw, (D_INPUT, 1), dtype=jnp.float32)
    b = jnp.zeros((1,), dtype=jnp.float32)
    X = jax.random.normal(kx, (N, D_INPUT), dtype=jnp.float32)

    # 1) Base case (single tile, f32).
    y = jax.block_until_ready(linear_regression_forward(X, W, b))
    y_ref = X @ W + b
    assert y.shape == (N, 1)
    assert jnp.allclose(y, y_ref, atol=1e-5, rtol=1e-5)

    # 2) Multi-tile grid path (exercise pipelining / tail handling), f32.
    N2 = 4096
    X2 = jax.random.normal(kx2, (N2, D_INPUT), dtype=jnp.float32)
    y2 = jax.block_until_ready(
        linear_regression_forward(X2, W, b, block_rows=256))
    y2_ref = X2 @ W + b
    assert y2.shape == (N2, 1)
    assert jnp.allclose(y2, y2_ref, atol=1e-5, rtol=1e-5)

    # 3) Ragged N (not a multiple of pack or the tile) -> wrapper padding path.
    N3 = 1000
    X3 = jax.random.normal(kx2, (N3, D_INPUT), dtype=jnp.float32)
    y3 = jax.block_until_ready(
        linear_regression_forward(X3, W, b, block_rows=64))
    assert y3.shape == (N3, 1)
    assert jnp.allclose(y3, X3 @ W + b, atol=1e-5, rtol=1e-5)

    # 4) bf16-streaming path (halves HBM bytes on X); looser tolerance.
    y4 = jax.block_until_ready(
        linear_regression_forward(X2, W, b, block_rows=256,
                                  compute_dtype=jnp.bfloat16))
    assert jnp.allclose(y4, y2_ref, atol=1e-2, rtol=1e-2)

    # TODO(synk): loss/optimizer/checkpoint methods of the module are training
    # utilities, not part of forward(); not implemented as kernels.
    print("KERNEL_OK")
</pallas_src>

<mosaic_0001>
module attributes {stable_mosaic.version = 11 : i64} {
  func.func @linreg_kernel(%arg0: i32, %arg1: memref<8x128xf32, #tpu.memory_space<vmem>>, %arg2: memref<128x4xf32, #tpu.memory_space<vmem>>, %arg3: memref<1x1xf32, #tpu.memory_space<smem>>, %arg4: memref<8x4xf32, #tpu.memory_space<vmem>>) attributes {dimension_semantics = [#tpu.dimension_semantics<parallel>], iteration_bounds = array<i64: 1>, scalar_prefetch = 0 : i64, scratch_operands = 0 : i64, tpu.core_type = #tpu.core_type<tc>, window_params = [{transform_indices = @transform_0, window_bounds = array<i64: 8, 128>}, {pipeline_mode = #tpu.pipeline_mode<synchronous>, transform_indices = @transform_1, window_bounds = array<i64: 128, 4>}, {transform_indices = @transform_2, window_bounds = array<i64: 1, 1>}, {transform_indices = @transform_3, window_bounds = array<i64: 8, 4>}]} {
    %c0 = arith.constant 0 : index
    %c0_0 = arith.constant 0 : index
    %0 = vector.load %arg1[%c0, %c0_0] : memref<8x128xf32, #tpu.memory_space<vmem>>, vector<8x128xf32>
    %c0_1 = arith.constant 0 : index
    %c0_2 = arith.constant 0 : index
    %1 = vector.load %arg2[%c0_1, %c0_2] : memref<128x4xf32, #tpu.memory_space<vmem>>, vector<128x4xf32>
    %cst = arith.constant dense<0.000000e+00> : vector<8x4xf32>
    %2 = tpu.matmul %0, %1, %cst {dimension_numbers = #tpu.dot_dimension_numbers<[1], [0], [0], [1], [0, 0, 1, 1], [], []>} : vector<8x128xf32>, vector<128x4xf32>, vector<8x4xf32> -> vector<8x4xf32>
    %c0_3 = arith.constant 0 : index
    %c0_4 = arith.constant 0 : index
    %3 = memref.load %arg3[%c0_3, %c0_4] : memref<1x1xf32, #tpu.memory_space<smem>>
    %4 = vector.broadcast %3 : f32 to vector<8x4xf32>
    %5 = arith.addf %2, %4 : vector<8x4xf32>
    %c0_5 = arith.constant 0 : index
    %c0_6 = arith.constant 0 : index
    %6 = vector.load %arg4[%c0_5, %c0_6] : memref<8x4xf32, #tpu.memory_space<vmem>>, vector<8x4xf32>
    tpu.vector_store %arg4[%c0_5, %c0_6], %5 {strides = array<i32>} : memref<8x4xf32, #tpu.memory_space<vmem>>, vector<8x4xf32>,
    return
  }
  func.func @transform_0(%arg0: i32) -> (i32, i32) {
    %c0_i32 = arith.constant 0 : i32
    %c0_i32_0 = arith.constant 0 : i32
    return %arg0, %c0_i32 : i32, i32
  }
  func.func @transform_1(%arg0: i32) -> (i32, i32) {
    %c0_i32 = arith.constant 0 : i32
    %c0_i32_0 = arith.constant 0 : i32
    %c0_i32_1 = arith.constant 0 : i32
    return %c0_i32, %c0_i32_0 : i32, i32
  }
  func.func @transform_2(%arg0: i32) -> (i32, i32) {
    %c0_i32 = arith.constant 0 : i32
    %c0_i32_0 = arith.constant 0 : i32
    %c0_i32_1 = arith.constant 0 : i32
    return %c0_i32, %c0_i32_0 : i32, i32
  }
  func.func @transform_3(%arg0: i32) -> (i32, i32) {
    %c0_i32 = arith.constant 0 : i32
    %c0_i32_0 = arith.constant 0 : i32
    return %arg0, %c0_i32 : i32, i32
  }
}

</mosaic_0001>

<bundles_post_ra>
// kernel: tpu_custom_call.1
= control target key start
LH: loop header
LB: loop body
LE: loop exit
PB: predicated region body
PF: predicated region fallthrough
CT: control target
= control target key end

     0   :  { %v189_v0 = vmov 0.0|0.0   ;;  %vm190_vm0 = vmmov 0   ;;  %v191_v4 = vmov 0.0   ;;  %vm104_vm1 = vcmask 31744   ;;  %s269_s1 = inlined_call_operand.vmem [shape: f32[128,4], index: 1, kind: input, shape index: {}]   ;;  %s270_s0 = inlined_call_operand.vmem [shape: f32[8,128], index: 0, kind: input, shape index: {}]   ;;  %s271_s2 = inlined_call_operand.<no memory space> [shape: f32[1,1], index: 2, kind: input, shape index: {}]   ;;  %s272_s3 = inlined_call_operand.vmem [shape: f32[8,4], index: 3, kind: output, shape index: {}]  }
   0x1   :  { %162 = vmatprep.subr.bf16.mxu0 %v189_v0  ;;  %v16_v1 = vld [vmem:[%s269_s1] sm:$0xff]  ;;  %v17_v2 = vld [vmem:[%s269_s1 + $0x8] sm:$0xff]  ;;  %v18_v3 = vld [vmem:[%s269_s1 + $0x10] sm:$0xff]  ;;  %159 = vmatprep.mubr.msk.f32.mxu0 %vm190_vm0, %v191_v4  ;;  %v33_v27 = vstv %s271_s2 }
   0x2   :  { %v163_v5 = vpack.c.bf16 %v17_v2, %v16_v1  ;;  %v19_v6 = vld [vmem:[%s269_s1 + $0x18] sm:$0xff]  ;;  %v20_v8 = vld [vmem:[%s269_s1 + $0x20] sm:$0xff]  ;;  %v21_v9 = vld [vmem:[%s269_s1 + $0x28] sm:$0xff] }
   0x3   :  { %v166_v7 = vpack.c.bf16 %v19_v6, %v18_v3  ;;  %v169_v10 = vpack.c.bf16 %v21_v9, %v20_v8  ;;  %v22_v11 = vld [vmem:[%s269_s1 + $0x30] sm:$0xff]  ;;  %v23_v12 = vld [vmem:[%s269_s1 + $0x38] sm:$0xff]  ;;  %v24_v14 = vld [vmem:[%s269_s1 + $0x40] sm:$0xff] }
   0x4   :  { %164 = vmatpush3.bf16.msra.mxu0 %v163_v5  ;;  %v172_v13 = vpack.c.bf16 %v23_v12, %v22_v11  ;;  %v25_v15 = vld [vmem:[%s269_s1 + $0x48] sm:$0xff]  ;;  %v26_v17 = vld [vmem:[%s269_s1 + $0x50] sm:$0xff]  ;;  %v27_v18 = vld [vmem:[%s269_s1 + $0x58] sm:$0xff] }
   0x5   :  { %165 = vmatprep.subr.bf16.mxu0 %v189_v0  ;;  %v175_v16 = vpack.c.bf16 %v25_v15, %v24_v14  ;;  %v178_v19 = vpack.c.bf16 %v27_v18, %v26_v17  ;;  %v28_v20 = vld [vmem:[%s269_s1 + $0x60] sm:$0xff]  ;;  %v29_v21 = vld [vmem:[%s269_s1 + $0x68] sm:$0xff]  ;;  %v30_v23 = vld [vmem:[%s269_s1 + $0x70] sm:$0xff] }
   0x6   :  { %v181_v22 = vpack.c.bf16 %v29_v21, %v28_v20  ;;  %v31_v24 = vld [vmem:[%s269_s1 + $0x78] sm:$0xff]  ;;  %v15_v26 = vld [vmem:[%s270_s0] sm:$0xff] }
   0x7   :  { %v184_v25 = vpack.c.bf16 %v31_v24, %v30_v23 }
   0x8   :  { %167 = vmatpush3.bf16.msra.mxu0 %v166_v7 }
   0x9   :  { %168 = vmatprep.subr.bf16.mxu0 %v189_v0 }
   0xc   :  { %170 = vmatpush3.bf16.msra.mxu0 %v169_v10 }
   0xd   :  { %171 = vmatprep.subr.bf16.mxu0 %v189_v0 }
  0x10   :  { %173 = vmatpush3.bf16.msra.mxu0 %v172_v13 }
  0x11   :  { %174 = vmatprep.subr.bf16.mxu0 %v189_v0 }
  0x14   :  { %176 = vmatpush3.bf16.msra.mxu0 %v175_v16 }
  0x15   :  { %177 = vmatprep.subr.bf16.mxu0 %v189_v0 }
  0x18   :  { %179 = vmatpush3.bf16.msra.mxu0 %v178_v19 }
  0x19   :  { %180 = vmatprep.subr.bf16.mxu0 %v189_v0 }
  0x1c   :  { %182 = vmatpush3.bf16.msra.mxu0 %v181_v22 }
  0x1d   :  { %183 = vmatprep.subr.bf16.mxu0 %v189_v0 }
  0x20   :  { %185 = vmatpush3.bf16.msra.mxu0 %v184_v25 }
  0x23   :  { %160 = vmatmul.mubr.f32.vlgmr.msra.gmra.mrb[0].mxu0 %v15_v26 }
  0xf6   :  { %v100_v28 = vpop.f32.mrb[0].mxu0 }
  0xf7   :  { %v101_v29 = vadd.f32 %v100_v28, %v33_v27  ;;  %v161_v30 = vpop.f32.mrb[1].mxu0 }
  0xf9   :  { %105 = vst.msk [vmem:[%s272_s3] sm:$0xff] %vm104_vm1, %v101_v29 }

</bundles_post_ra>
